<compile_context>
chip_gen: v7x
topology: tpu7x:2x2x1
jax: 0.10.0
libtpu: 0.0.40
codegen_flags: <defaults>
</compile_context>

<pallas_src>
import functools

import jax
import jax.numpy as jnp
import numpy as np
from jax.experimental import pallas as pl
from jax.experimental.pallas import tpu as pltpu


# ----------------------------- configuration --------------------------------
CONFIG = {
    "model": "pcssr",          # 'pcssr' -> reduction sign = -1, 'rcssr' -> +1
    "error_measure": "L2",     # 'L1' or 'L2'
    "gamma": 1.0,
    "ae_hidden": [16],         # hidden 1x1-conv channels of each class AE
    "ae_latent": 8,            # latent channels of each class AE
}
CLIP_LEN = 100.0               # CSSRClassifier.clip_len
MATMUL_DTYPE = jnp.bfloat16    # MXU operand dtype (accumulation stays f32)


# ------------------------------ Pallas kernel --------------------------------
def _cssr_head_kernel(x_ref, r_ref, *rest, tanh_flags, use_l1, num_classes):
    """Fused (all-classes) CSSR AE head on one pixel tile.

    x_ref : (C, TN)   feature pixels; channels in sublanes, pixels in lanes, f32
    r_ref : (K, K*C)  constant reduction matrix (sign * gamma folded in), f32
    rest  : packed transposed AE weights (bf16), ..., out_ref (K, TN) f32
    """
    w_refs = rest[:-1]
    out_ref = rest[-1]

    xv = x_ref[...]                                        # (C, TN) f32
    h = xv
    for w_ref, act in zip(w_refs, tanh_flags):
        # packed weight is (out, in); activations stay (width, TN) lane-dense
        h = jnp.dot(w_ref[...], h.astype(w_ref.dtype),
                    preferred_element_type=jnp.float32)
        if act:
            h = jnp.tanh(h)
    # h: fused reconstruction for all classes, (K*C, TN) f32
    x_rep = jnp.concatenate([xv] * num_classes, axis=0)    # (K*C, TN)
    diff = h - x_rep
    e = jnp.abs(diff) if use_l1 else diff * diff
    # channel reduction rides the MXU: (K, K*C) @ (K*C, TN) -> (K, TN)
    err = jnp.dot(r_ref[...], e, preferred_element_type=jnp.float32)
    out_ref[...] = jnp.clip(err, -CLIP_LEN, CLIP_LEN)


def cssr_classifier_forward(feat_nchw, packed, config, *, row_tile=512):
    """CSSRClassifier forward: feat (B, C, H, W) -> logits (B, K, H, W)."""
    B, C, H, W = feat_nchw.shape
    w_list, r_mat, tanh_flags = packed
    K = r_mat.shape[0]
    use_l1 = config["error_measure"] == "L1"

    # NCHW -> (C, N): only swaps B and C (each H*W chunk stays contiguous).
    # TODO(synk): fuse this transpose into the kernel DMA (spatially-tiled
    # BlockSpec over NCHW) or have the backbone emit channels-last directly.
    N = B * H * W
    x_cn = jnp.transpose(feat_nchw, (1, 0, 2, 3)).reshape(C, N)
    TN = row_tile
    n_pad = (-N) % TN
    if n_pad:
        x_cn = jnp.pad(x_cn, ((0, 0), (0, n_pad)))
    N_pad = N + n_pad

    kernel = functools.partial(
        _cssr_head_kernel, tanh_flags=tuple(tanh_flags),
        use_l1=use_l1, num_classes=K)

    full = lambda a: pl.BlockSpec(a.shape, lambda i: (0,) * a.ndim)
    in_specs = ([pl.BlockSpec((C, TN), lambda i: (0, i)), full(r_mat)]
                + [full(w) for w in w_list])

    # advisory cost estimate so XLA schedules surrounding ops sensibly
    flops = sum(2 * N_pad * int(w.shape[0]) * int(w.shape[1]) for w in w_list)
    flops += 2 * N_pad * K * (K * C)
    trans = sum(N_pad * int(w.shape[0])
                for w, a in zip(w_list, tanh_flags) if a)
    bytes_accessed = (x_cn.size * x_cn.dtype.itemsize + N_pad * K * 4
                      + sum(int(w.size) * w.dtype.itemsize for w in w_list)
                      + int(r_mat.size) * 4)

    out = pl.pallas_call(
        kernel,
        out_shape=jax.ShapeDtypeStruct((K, N_pad), jnp.float32),
        grid=(N_pad // TN,),
        in_specs=in_specs,
        out_specs=pl.BlockSpec((K, TN), lambda i: (0, i)),
        compiler_params=pltpu.CompilerParams(
            dimension_semantics=("parallel",)),
        cost_estimate=pl.CostEstimate(
            flops=flops, transcendentals=trans, bytes_accessed=bytes_accessed),
    )(x_cn, r_mat, *w_list)

    out = out[:, :N]                                        # (K, N)
    # (K, N) -> (K, B, H, W) -> (B, K, H, W)  (matches torch.cat(..., dim=1))
    return jnp.transpose(out.reshape(K, B, H, W), (1, 0, 2, 3))


# -------------------------- deterministic parameters -------------------------
def init_cssr_weights(key, in_channels, num_classes, hidden, latent):
    """Per-class AE 1x1-conv weights, stacked over classes, stored as (in, out)."""
    def conv_w(k, cin, cout):
        # deterministic stand-in for Conv2d(cin, cout, 1, bias=False) weights
        return jax.random.uniform(k, (cin, cout), jnp.float32,
                                  minval=-1.0, maxval=1.0) / np.sqrt(float(cin))

    chans = [in_channels] + list(hidden)
    nh = len(hidden)
    keys = iter(jax.random.split(key, max(1, num_classes * (2 * nh + 2))))
    enc_cls = [[] for _ in range(nh)]
    dec_cls = [[] for _ in range(nh)]
    lat_list, dlat_list = [], []
    for _ in range(num_classes):
        for i in range(nh):
            enc_cls[i].append(conv_w(next(keys), chans[i], chans[i + 1]))
            dec_cls[i].append(conv_w(next(keys), chans[i + 1], chans[i]))
        lat_list.append(conv_w(next(keys), chans[-1], latent))
        dlat_list.append(conv_w(next(keys), latent, chans[-1]))
    enc_ws = [jnp.stack(l) for l in enc_cls]   # each (K, cin, cout)
    dec_ws = [jnp.stack(l) for l in dec_cls]   # each (K, chans[i+1], chans[i])
    lat_w = jnp.stack(lat_list)                # (K, chans[-1], latent)
    dlat_w = jnp.stack(dlat_list)              # (K, latent, chans[-1])
    return enc_ws, lat_w, dlat_w, dec_ws


# ------------------------------ weight packing --------------------------------
def _concat_pack_T(w_stack, dtype):
    """(K, cin, cout) per-class weights with a SHARED input -> (K*cout, cin)."""
    K, cin, cout = w_stack.shape
    return jnp.transpose(w_stack, (0, 2, 1)).reshape(K * cout, cin).astype(dtype)


def _blockdiag_pack_T(w_stack, dtype):
    """(K, cin, cout) per-class weights -> block-diag of W_k^T: (K*cout, K*cin)."""
    K, cin, cout = w_stack.shape
    wt = jnp.transpose(w_stack, (0, 2, 1))          # (K, cout, cin)
    out = jnp.zeros((K * cout, K * cin), jnp.float32)
    for k in range(K):
        out = out.at[k * cout:(k + 1) * cout, k * cin:(k + 1) * cin].set(wt[k])
    return out.astype(dtype)


def pack_cssr_weights(weights, in_channels, config, dtype=MATMUL_DTYPE):
    """Class-fuse the per-class AE weights into lane-dense packed matrices."""
    enc_ws, lat_w, dlat_w, dec_ws = weights
    K = lat_w.shape[0]
    nh = len(enc_ws)
    C = in_channels
    reduction = (-1.0 if config["model"] == "pcssr" else 1.0) * config["gamma"]

    layers, flags = [], []
    if nh > 0:
        layers.append(_concat_pack_T(enc_ws[0], dtype)); flags.append(True)
        for i in range(1, nh):
            layers.append(_blockdiag_pack_T(enc_ws[i], dtype)); flags.append(True)
        layers.append(_blockdiag_pack_T(lat_w, dtype)); flags.append(True)
        layers.append(_blockdiag_pack_T(dlat_w, dtype)); flags.append(True)
        for i in range(nh - 1, -1, -1):              # decoder in apply order
            layers.append(_blockdiag_pack_T(dec_ws[i], dtype))
            flags.append(i != 0)                     # last applied has no tanh
    else:
        layers.append(_concat_pack_T(lat_w, dtype)); flags.append(True)
        layers.append(_blockdiag_pack_T(dlat_w, dtype)); flags.append(False)

    # reduction matrix: err[k] = reduction * sum over class-k channel block
    r_mat = jnp.zeros((K, K * C), jnp.float32)
    for k in range(K):
        r_mat = r_mat.at[k, k * C:(k + 1) * C].set(reduction)
    return layers, r_mat, tuple(flags)


# ------------------------------ pure-JAX reference ----------------------------
def reference_forward(feat_nchw, weights, config, matmul_dtype=MATMUL_DTYPE):
    """Per-class reference with the same matmul operand precision as the kernel."""
    B, C, H, W = feat_nchw.shape
    enc_ws, lat_w, dlat_w, dec_ws = weights
    K = lat_w.shape[0]
    nh = len(enc_ws)
    use_l1 = config["error_measure"] == "L1"
    reduction = (-1.0 if config["model"] == "pcssr" else 1.0) * config["gamma"]

    def mm(a, w):
        return jnp.dot(a.astype(matmul_dtype), w.astype(matmul_dtype),
                       preferred_element_type=jnp.float32)

    x = jnp.transpose(feat_nchw, (0, 2, 3, 1)).reshape(B * H * W, C)
    outs = []
    for k in range(K):
        h = x
        for i in range(nh):
            h = jnp.tanh(mm(h, enc_ws[i][k]))
        lt = jnp.tanh(mm(h, lat_w[k]))
        d = mm(lt, dlat_w[k])
        if nh > 0:
            d = jnp.tanh(d)
        for i in range(nh - 1, -1, -1):
            d = mm(d, dec_ws[i][k])
            if i != 0:
                d = jnp.tanh(d)
        diff = d - x
        if use_l1:
            err = jnp.sum(jnp.abs(diff), axis=1, keepdims=True) * reduction
        else:
            err = jnp.sum(diff * diff, axis=1, keepdims=True) * reduction
        outs.append(jnp.clip(err, -CLIP_LEN, CLIP_LEN))
    out = jnp.concatenate(outs, axis=1)
    return jnp.transpose(out.reshape(B, H, W, K), (0, 3, 1, 2))


# ----------------------------------- main -------------------------------------
if __name__ == "__main__":
    B, C, H, W = 4, 32, 16, 16       # backbone feature map (NCHW); N = 1024
    NUM_CLASSES = 4

    key = jax.random.PRNGKey(0)
    k_feat, k_w = jax.random.split(key)
    feat = jax.random.normal(k_feat, (B, C, H, W), jnp.float32)

    weights = init_cssr_weights(
        k_w, C, NUM_CLASSES, CONFIG["ae_hidden"], CONFIG["ae_latent"])
    packed = pack_cssr_weights(weights, C, CONFIG)

    @jax.jit
    def run(f):
        return cssr_classifier_forward(f, packed, CONFIG, row_tile=512)

    logits = jax.block_until_ready(run(feat))
    ref = jax.block_until_ready(reference_forward(feat, weights, CONFIG))

    assert logits.shape == (B, NUM_CLASSES, H, W)
    np.testing.assert_allclose(np.asarray(logits), np.asarray(ref),
                               rtol=2e-2, atol=1e-1)
    print("KERNEL_OK")
</pallas_src>

<mosaic_0001>
module attributes {stable_mosaic.version = 11 : i64} {
  func.func @_cssr_head_kernel(%arg0: i32, %arg1: memref<32x512xf32, #tpu.memory_space<vmem>>, %arg2: memref<4x128xf32, #tpu.memory_space<vmem>>, %arg3: memref<64x32xbf16, #tpu.memory_space<vmem>>, %arg4: memref<32x64xbf16, #tpu.memory_space<vmem>>, %arg5: memref<64x32xbf16, #tpu.memory_space<vmem>>, %arg6: memref<128x64xbf16, #tpu.memory_space<vmem>>, %arg7: memref<4x512xf32, #tpu.memory_space<vmem>>) attributes {dimension_semantics = [#tpu.dimension_semantics<parallel>], iteration_bounds = array<i64: 2>, scalar_prefetch = 0 : i64, scratch_operands = 0 : i64, tpu.core_type = #tpu.core_type<tc>, window_params = [{transform_indices = @transform_0, window_bounds = array<i64: 32, 512>}, {pipeline_mode = #tpu.pipeline_mode<synchronous>, transform_indices = @transform_1, window_bounds = array<i64: 4, 128>}, {pipeline_mode = #tpu.pipeline_mode<synchronous>, transform_indices = @transform_2, window_bounds = array<i64: 64, 32>}, {pipeline_mode = #tpu.pipeline_mode<synchronous>, transform_indices = @transform_3, window_bounds = array<i64: 32, 64>}, {pipeline_mode = #tpu.pipeline_mode<synchronous>, transform_indices = @transform_4, window_bounds = array<i64: 64, 32>}, {pipeline_mode = #tpu.pipeline_mode<synchronous>, transform_indices = @transform_5, window_bounds = array<i64: 128, 64>}, {transform_indices = @transform_6, window_bounds = array<i64: 4, 512>}]} {
    %c0 = arith.constant 0 : index
    %c0_0 = arith.constant 0 : index
    %0 = vector.load %arg1[%c0, %c0_0] : memref<32x512xf32, #tpu.memory_space<vmem>>, vector<32x512xf32>
    %c0_1 = arith.constant 0 : index
    %c0_2 = arith.constant 0 : index
    %1 = vector.load %arg3[%c0_1, %c0_2] : memref<64x32xbf16, #tpu.memory_space<vmem>>, vector<64x32xbf16>
    %2 = arith.truncf %0 : vector<32x512xf32> to vector<32x512xbf16>
    %cst = arith.constant dense<0.000000e+00> : vector<64x512xf32>
    %3 = tpu.matmul %1, %2, %cst {dimension_numbers = #tpu.dot_dimension_numbers<[1], [0], [0], [1], [0, 0, 1, 1], [], []>} : vector<64x32xbf16>, vector<32x512xbf16>, vector<64x512xf32> -> vector<64x512xf32>
    %4 = math.tanh %3 : vector<64x512xf32>
    %c0_3 = arith.constant 0 : index
    %c0_4 = arith.constant 0 : index
    %5 = vector.load %arg4[%c0_3, %c0_4] : memref<32x64xbf16, #tpu.memory_space<vmem>>, vector<32x64xbf16>
    %6 = arith.truncf %4 : vector<64x512xf32> to vector<64x512xbf16>
    %cst_5 = arith.constant dense<0.000000e+00> : vector<32x512xf32>
    %7 = tpu.matmul %5, %6, %cst_5 {dimension_numbers = #tpu.dot_dimension_numbers<[1], [0], [0], [1], [0, 0, 1, 1], [], []>} : vector<32x64xbf16>, vector<64x512xbf16>, vector<32x512xf32> -> vector<32x512xf32>
    %8 = math.tanh %7 : vector<32x512xf32>
    %c0_6 = arith.constant 0 : index
    %c0_7 = arith.constant 0 : index
    %9 = vector.load %arg5[%c0_6, %c0_7] : memref<64x32xbf16, #tpu.memory_space<vmem>>, vector<64x32xbf16>
    %10 = arith.truncf %8 : vector<32x512xf32> to vector<32x512xbf16>
    %cst_8 = arith.constant dense<0.000000e+00> : vector<64x512xf32>
    %11 = tpu.matmul %9, %10, %cst_8 {dimension_numbers = #tpu.dot_dimension_numbers<[1], [0], [0], [1], [0, 0, 1, 1], [], []>} : vector<64x32xbf16>, vector<32x512xbf16>, vector<64x512xf32> -> vector<64x512xf32>
    %12 = math.tanh %11 : vector<64x512xf32>
    %c0_9 = arith.constant 0 : index
    %c0_10 = arith.constant 0 : index
    %13 = vector.load %arg6[%c0_9, %c0_10] : memref<128x64xbf16, #tpu.memory_space<vmem>>, vector<128x64xbf16>
    %14 = arith.truncf %12 : vector<64x512xf32> to vector<64x512xbf16>
    %cst_11 = arith.constant dense<0.000000e+00> : vector<128x512xf32>
    %15 = tpu.matmul %13, %14, %cst_11 {dimension_numbers = #tpu.dot_dimension_numbers<[1], [0], [0], [1], [0, 0, 1, 1], [], []>} : vector<128x64xbf16>, vector<64x512xbf16>, vector<128x512xf32> -> vector<128x512xf32>
    %16 = tpu.concatenate %0, %0, %0, %0 in 0 : vector<32x512xf32>, vector<32x512xf32>, vector<32x512xf32>, vector<32x512xf32> -> vector<128x512xf32>
    %17 = arith.subf %15, %16 : vector<128x512xf32>
    %18 = arith.mulf %17, %17 : vector<128x512xf32>
    %c0_12 = arith.constant 0 : index
    %c0_13 = arith.constant 0 : index
    %19 = vector.load %arg2[%c0_12, %c0_13] : memref<4x128xf32, #tpu.memory_space<vmem>>, vector<4x128xf32>
    %cst_14 = arith.constant dense<0.000000e+00> : vector<4x512xf32>
    %20 = tpu.matmul %19, %18, %cst_14 {dimension_numbers = #tpu.dot_dimension_numbers<[1], [0], [0], [1], [0, 0, 1, 1], [], []>} : vector<4x128xf32>, vector<128x512xf32>, vector<4x512xf32> -> vector<4x512xf32>
    %cst_15 = arith.constant -1.000000e+02 : f32
    %cst_16 = arith.constant 1.000000e+02 : f32
    %21 = vector.broadcast %cst_15 : f32 to vector<4x512xf32>
    %22 = arith.maximumf %21, %20 : vector<4x512xf32>
    %23 = vector.broadcast %cst_16 : f32 to vector<4x512xf32>
    %24 = arith.minimumf %23, %22 : vector<4x512xf32>
    %c0_17 = arith.constant 0 : index
    %c0_18 = arith.constant 0 : index
    %25 = vector.load %arg7[%c0_17, %c0_18] : memref<4x512xf32, #tpu.memory_space<vmem>>, vector<4x512xf32>
    tpu.vector_store %arg7[%c0_17, %c0_18], %24 {strides = array<i32>} : memref<4x512xf32, #tpu.memory_space<vmem>>, vector<4x512xf32>,
    return
  }
  func.func @transform_0(%arg0: i32) -> (i32, i32) {
    %c0_i32 = arith.constant 0 : i32
    %c0_i32_0 = arith.constant 0 : i32
    return %c0_i32, %arg0 : i32, i32
  }
  func.func @transform_1(%arg0: i32) -> (i32, i32) {
    %c0_i32 = arith.constant 0 : i32
    %c0_i32_0 = arith.constant 0 : i32
    %c0_i32_1 = arith.constant 0 : i32
    return %c0_i32, %c0_i32_0 : i32, i32
  }
  func.func @transform_2(%arg0: i32) -> (i32, i32) {
    %c0_i32 = arith.constant 0 : i32
    %c0_i32_0 = arith.constant 0 : i32
    %c0_i32_1 = arith.constant 0 : i32
    return %c0_i32, %c0_i32_0 : i32, i32
  }
  func.func @transform_3(%arg0: i32) -> (i32, i32) {
    %c0_i32 = arith.constant 0 : i32
    %c0_i32_0 = arith.constant 0 : i32
    %c0_i32_1 = arith.constant 0 : i32
    return %c0_i32, %c0_i32_0 : i32, i32
  }
  func.func @transform_4(%arg0: i32) -> (i32, i32) {
    %c0_i32 = arith.constant 0 : i32
    %c0_i32_0 = arith.constant 0 : i32
    %c0_i32_1 = arith.constant 0 : i32
    return %c0_i32, %c0_i32_0 : i32, i32
  }
  func.func @transform_5(%arg0: i32) -> (i32, i32) {
    %c0_i32 = arith.constant 0 : i32
    %c0_i32_0 = arith.constant 0 : i32
    %c0_i32_1 = arith.constant 0 : i32
    return %c0_i32, %c0_i32_0 : i32, i32
  }
  func.func @transform_6(%arg0: i32) -> (i32, i32) {
    %c0_i32 = arith.constant 0 : i32
    %c0_i32_0 = arith.constant 0 : i32
    return %c0_i32, %arg0 : i32, i32
  }
}

</mosaic_0001>

<bundles_post_ra>
// kernel: run.1
= control target key start
LH: loop header
LB: loop body
LE: loop exit
PB: predicated region body
PF: predicated region fallthrough
CT: control target
= control target key end

     0   :  { %s2023_s21 = smov 0   ;;  %s2025_s22 = smov 0   ;;  %s2400_s0 = inlined_call_operand.vmem [shape: f32[32,1024], index: 0, kind: input, shape index: {}]   ;;  %s2401_s1 = inlined_call_operand.vmem [shape: f32[4,128], index: 1, kind: input, shape index: {}]   ;;  %s2402_s2 = inlined_call_operand.vmem [shape: bf16[64,32], index: 2, kind: input, shape index: {}]   ;;  %s2403_s3 = inlined_call_operand.vmem [shape: bf16[32,64], index: 3, kind: input, shape index: {}]   ;;  %s2404_s4 = inlined_call_operand.vmem [shape: bf16[64,32], index: 4, kind: input, shape index: {}]   ;;  %s2405_s5 = inlined_call_operand.vmem [shape: bf16[128,64], index: 5, kind: input, shape index: {}]   ;;  %s2406_s6 = inlined_call_operand.vmem [shape: f32[4,1024], index: 6, kind: output, shape index: {}]  }
   0x1   :  { %s2027_s23 = smov 0  }
   0x2 LB: > { %s1606_s24 = sadd.s32 4294967295, %s1984_s23   ;;  %s2040_s25 = sadd.s32 1, %s1984_s23   ;;  %s1984_s23 = sphi %s2027_s23, %s2409_s23   ;;  %s1980_s22 = sphi %s2025_s22, %s2408_s22   ;;  %s1976_s21 = sphi %s2023_s21, %s2407_s21  }
   0x3   : > { %s20_s26 = ssub.s32 %s1984_s23, %s2040_s25  ;;  %s23_s27 = sadd.s32 1, %s1980_s22 }
   0x4   : > { %p21_p0 = scmp.eq.s32.totalorder %s20_s26, 0  ;;  %p30_p1 = scmp.ne.s32.totalorder %s1980_s22, %s1976_s21 }
   0x5   : > { %p31_p2 = scmp.eq.s32.totalorder %s1984_s23, 0  ;;  %p1609_p4 = scmp.ge.s32.totalorder %s1984_s23, 2 }
   0x6   : > { %s2049_s28 = scalar_select %p21_p0, %s1980_s22, %s23_s27  }
   0x7   : > { %p32_p3 = por %p31_p2, %p30_p1  ;;  %202 = sbr.rel (%p1609_p4) target bundleno = 26 (0x1a), region = 36 }
   0xe   : > { %205 = sbr.rel (!%p32_p3) target bundleno = 26 (0x1a), region = 40  ;;  %s207_s29 = sand.u32 (%p32_p3), 1, %s1980_s22  }
   0xf   : > { %s1677_s30 = sshll.u32 (%p32_p3), %s1984_s23, 5  ;;  %s1610_s7 = sshll.u32 (%p32_p3), %s207_s29, 7 }
  0x10   : > { %s2057_s10 = scalar_lea.vmem (%p32_p3), %s2400_s0, %s1677_s30  ;;  %s209_s11 = scalar_lea.vmem (%p32_p3), [#allocation2], %s1610_s7 }
  0x11   : > { %v225_v0 = vld [vmem:[%s2057_s10] sm:$0xff] (%p32_p3)  ;;  %v227_v1 = vld [vmem:[%s2057_s10 + $0x8] sm:$0xff] (%p32_p3)  ;;  %v229_v2 = vld [vmem:[%s2057_s10 + $0x10] sm:$0xff] (%p32_p3) }
  0x12   : > { %226 = vst [vmem:[%s209_s11] sm:$0xff] (%p32_p3), %v225_v0  ;;  %228 = vst [vmem:[%s209_s11 + $0x8] sm:$0xff] (%p32_p3), %v227_v1  ;;  %v231_v3 = vld [vmem:[%s2057_s10 + $0x18] sm:$0xff] (%p32_p3)  ;;  %v233_v4 = vld [vmem:[%s2057_s10 + $0x40] sm:$0xff] (%p32_p3) }
  0x13   : > { %230 = vst [vmem:[%s209_s11 + $0x10] sm:$0xff] (%p32_p3), %v229_v2  ;;  %v235_v5 = vld [vmem:[%s2057_s10 + $0x48] sm:$0xff] (%p32_p3)  ;;  %232 = vst [vmem:[%s209_s11 + $0x18] sm:$0xff] (%p32_p3), %v231_v3  ;;  %v237_v6 = vld [vmem:[%s2057_s10 + $0x50] sm:$0xff] (%p32_p3) }
  0x14   : > { %234 = vst [vmem:[%s209_s11 + $0x20] sm:$0xff] (%p32_p3), %v233_v4  ;;  %236 = vst [vmem:[%s209_s11 + $0x28] sm:$0xff] (%p32_p3), %v235_v5  ;;  %v239_v7 = vld [vmem:[%s2057_s10 + $0x58] sm:$0xff] (%p32_p3)  ;;  %v241_v8 = vld [vmem:[%s2057_s10 + $0x80] sm:$0xff] (%p32_p3) }
  0x15   : > { %238 = vst [vmem:[%s209_s11 + $0x30] sm:$0xff] %v237_v6  ;;  %240 = vst [vmem:[%s209_s11 + $0x38] sm:$0xff] %v239_v7  ;;  %v243_v9 = vld [vmem:[%s2057_s10 + $0x88] sm:$0xff]  ;;  %v245_v10 = vld [vmem:[%s2057_s10 + $0x90] sm:$0xff] }
  0x16   : > { %242 = vst [vmem:[%s209_s11 + $0x40] sm:$0xff] %v241_v8  ;;  %v247_v11 = vld [vmem:[%s2057_s10 + $0x98] sm:$0xff]  ;;  %244 = vst [vmem:[%s209_s11 + $0x48] sm:$0xff] %v243_v9  ;;  %v249_v12 = vld [vmem:[%s2057_s10 + $0xc0] sm:$0xff] }
  0x17   : > { %246 = vst [vmem:[%s209_s11 + $0x50] sm:$0xff] %v245_v10  ;;  %248 = vst [vmem:[%s209_s11 + $0x58] sm:$0xff] %v247_v11  ;;  %v251_v13 = vld [vmem:[%s2057_s10 + $0xc8] sm:$0xff]  ;;  %v253_v14 = vld [vmem:[%s2057_s10 + $0xd0] sm:$0xff] }
  0x18   : > { %250 = vst [vmem:[%s209_s11 + $0x60] sm:$0xff] %v249_v12  ;;  %252 = vst [vmem:[%s209_s11 + $0x68] sm:$0xff] %v251_v13  ;;  %v255_v15 = vld [vmem:[%s2057_s10 + $0xd8] sm:$0xff] }
  0x19   : > { %254 = vst [vmem:[%s209_s11 + $0x70] sm:$0xff] %v253_v14  ;;  %256 = vst [vmem:[%s209_s11 + $0x78] sm:$0xff] %v255_v15 }
  0x1a PF: > { %p1613_p5 = scmp.ge.s32.totalorder %s1984_s23, 1  ;;  %p261_p6 = scmp.lt.s32.totalorder %s1984_s23, 3 }
  0x1c   : > { %p262_p7 = pnand %p1613_p5, %p261_p6 }
  0x1d   : > { %s268_s12 = sand.u32 (!%p262_p7), 1, %s1976_s21   ;;  %v1986_v16 = vmov (!%p262_p7), 0   ;;  %v1768_v41 = vld [vmem:[%s2402_s2] sm:$0xff] (!%p262_p7)   ;;  %vm357_vm0 = vcmask (!%p262_p7), 261120   ;;  %v1769_v42 = vld [vmem:[%s2402_s2 + $0x8] sm:$0xff] (!%p262_p7)   ;;  %v1770_v43 = vld [vmem:[%s2402_s2 + $0x10] sm:$0xff] (!%p262_p7)  }
  0x1e   : > { %265 = sbr.rel (%p262_p7) target bundleno = 1309 (0x51d), region = 63  ;;  %s1614_s13 = sshll.u32 (!%p262_p7), %s268_s12, 7  ;;  %402 = vmatprep.mubr.bf16.mxu0 (!%p262_p7), %v1986_v16  ;;  %475 = vmatprep.mubr.bf16.mxu1 (!%p262_p7), %v1986_v16  ;;  %v1771_v44 = vld [vmem:[%s2402_s2 + $0x18] sm:$0xff] (!%p262_p7)   ;;  %vm578_vm1 = vcmask (!%p262_p7), 523264  }
  0x1f   : > { %s2080_s14 = scalar_lea.vmem (!%p262_p7), [#allocation2], %s1614_s13  ;;  %s1615_s16 = sshll.u32 (!%p262_p7), %s1606_s24, 2 }
  0x20   : > { %v2083_v17 = vld [vmem:[%s2080_s14 + $0x8] sm:$0xff] (!%p262_p7)  ;;  %v2089_v19 = vld [vmem:[%s2080_s14 + $0x18] sm:$0xff] (!%p262_p7)  ;;  %v2097_v22 = vld [vmem:[%s2080_s14] sm:$0xff] (!%p262_p7)  ;;  %p299_p8 = scmp.lt.s32.totalorder (!%p262_p7), %s1615_s16, 7 }
  0x21   : > { %v2086_v18 = vld [vmem:[%s2080_s14 + $0x28] sm:$0xff] (!%p262_p7)  ;;  %v2094_v21 = vld [vmem:[%s2080_s14 + $0x38] sm:$0xff] (!%p262_p7)  ;;  %v2100_v23 = vld [vmem:[%s2080_s14 + $0x20] sm:$0xff] (!%p262_p7) }
  0x22   : > { %v330_v20 = vpack.c.bf16 (!%p262_p7), %v2086_v18, %v2083_v17  ;;  %v332_v24 = vpack.c.bf16 (!%p262_p7), %v2094_v21, %v2089_v19  ;;  %v329_v25 = vpack.c.bf16 (!%p262_p7), %v2100_v23, %v2097_v22  ;;  %v2107_v26 = vld [vmem:[%s2080_s14 + $0x10] sm:$0xff] (!%p262_p7)  ;;  %v2113_v28 = vld [vmem:[%s2080_s14 + $0x48] sm:$0xff] (!%p262_p7)  ;;  %v2121_v31 = vld [vmem:[%s2080_s14 + $0x58] sm:$0xff] (!%p262_p7) }
  0x23   : > { %v2110_v27 = vld [vmem:[%s2080_s14 + $0x30] sm:$0xff] (!%p262_p7)  ;;  %v2118_v30 = vld [vmem:[%s2080_s14 + $0x68] sm:$0xff] (!%p262_p7)  ;;  %v2124_v32 = vld [vmem:[%s2080_s14 + $0x78] sm:$0xff] (!%p262_p7) }
  0x24   : > { %370 = vmatprep.subr.bf16.mxu0 (!%p262_p7), %v330_v20  ;;  %v331_v29 = vpack.c.bf16 (!%p262_p7), %v2110_v27, %v2107_v26  ;;  %443 = vmatprep.subr.bf16.mxu1 (!%p262_p7), %v332_v24  ;;  %v334_v33 = vpack.c.bf16 (!%p262_p7), %v2118_v30, %v2113_v28  ;;  %v336_v34 = vpack.c.bf16 (!%p262_p7), %v2124_v32, %v2121_v31  ;;  %v2131_v35 = vld [vmem:[%s2080_s14 + $0x40] sm:$0xff] (!%p262_p7)  ;;  %v2137_v37 = vld [vmem:[%s2080_s14 + $0x50] sm:$0xff] (!%p262_p7) }
  0x25   : > { %371 = vmatpush1.bf16.msra.mxu0 %v329_v25  ;;  %v2134_v36 = vld [vmem:[%s2080_s14 + $0x60] sm:$0xff]  ;;  %v2142_v39 = vld [vmem:[%s2080_s14 + $0x70] sm:$0xff]  ;;  %s2411_s16 = smov (!%p299_p8, %s1615_s16), 7 }
  0x26   : > { %444 = vmatpush1.bf16.msra.mxu1 %v331_v29  ;;  %v333_v38 = vpack.c.bf16 %v2134_v36, %v2131_v35  ;;  %372 = vmatprep.subr.bf16.mxu0 %v334_v33  ;;  %v335_v40 = vpack.c.bf16 %v2142_v39, %v2137_v37  ;;  %s1616_s17 = sshll.u32 %s2411_s16, 2 }
  0x27   : > { %445 = vmatprep.subr.bf16.mxu1 %v336_v34  ;;  %s302_s20 = scalar_lea.vmem %s2406_s6, %s1616_s17 }
  0x29   : > { %373 = vmatpush1.bf16.msra.mxu0 %v333_v38 }
  0x2a   : > { %446 = vmatpush1.bf16.msra.mxu1 %v335_v40 }
  0x2c   : > { %1621 = vmatmul.mubr.msk.bf16.vlgmr.msra.gmra.mrb[0].mxu0 %vm357_vm0, %v1768_v41 }
  0x2d   : > { %1625 = vmatmul.mubr.msk.bf16.vlgmr.msra.gmra.mrb[0].mxu1 %vm357_vm0, %v1768_v41  ;;  %412 = vmatprep.mubr.bf16.mxu0 %v1986_v16 }
  0x2e   : > { %485 = vmatprep.mubr.bf16.mxu1 %v1986_v16 }
  0x34   : > { %1622 = vmatmul.mubr.msk.bf16.gmra.mrb[4].mxu0 %vm357_vm0, %v1769_v42 }
  0x35   : > { %1626 = vmatmul.mubr.msk.bf16.gmra.mrb[4].mxu1 %vm357_vm0, %v1769_v42  ;;  %422 = vmatprep.mubr.bf16.mxu0 %v1986_v16 }
  0x36   : > { %495 = vmatprep.mubr.bf16.mxu1 %v1986_v16 }
  0x3c   : > { %1623 = vmatmul.mubr.msk.bf16.gmra.mrb[8].mxu0 %vm357_vm0, %v1770_v43 }
  0x3d   : > { %1627 = vmatmul.mubr.msk.bf16.gmra.mrb[8].mxu1 %vm357_vm0, %v1770_v43  ;;  %432 = vmatprep.mubr.bf16.mxu0 %v1986_v16 }
  0x3e   : > { %505 = vmatprep.mubr.bf16.mxu1 %v1986_v16 }
  0x44   : > { %1624 = vmatmul.mubr.msk.bf16.gmra.mrb[12].mxu0 %vm357_vm0, %v1771_v44 }
  0x45   : > { %1628 = vmatmul.mubr.msk.bf16.gmra.mrb[12].mxu1 %vm357_vm0, %v1771_v44  ;;  %617 = vmatprep.mubr.bf16.mxu0 %v1986_v16 }
  0x46   : > { %670 = vmatprep.mubr.bf16.mxu1 %v1986_v16 }
  0xff   : > { %v404_v45 = vpop.f32.mrb[0].mxu0 }
 0x100   : > { %1786 = vtanh.f32 %v404_v45  ;;  %v477_v46 = vpop.f32.mrb[0].mxu1  ;;  %v406_v47 = vpop.f32.mrb[1].mxu0 }
 0x101   : > { %1788 = vtanh.f32 %v477_v46  ;;  %v479_v48 = vpop.f32.mrb[1].mxu1  ;;  %v408_v49 = vpop.f32.mrb[2].mxu0 }
 0x102   : > { %1790 = vtanh.f32 %v406_v47  ;;  %v481_v50 = vpop.f32.mrb[2].mxu1  ;;  %v410_v51 = vpop.f32.mrb[3].mxu0 }
 0x103   : > { %1792 = vtanh.f32 %v479_v48  ;;  %v483_v52 = vpop.f32.mrb[3].mxu1 }
 0x104   : > { %1794 = vtanh.f32 %v408_v49 }
 0x105   : > { %1796 = vtanh.f32 %v481_v50 }
 0x106   : > { %1798 = vtanh.f32 %v410_v51 }
 0x107   : > { %1800 = vtanh.f32 %v483_v52  ;;  %v414_v53 = vpop.f32.mrb[4].mxu0 }
 0x108   : > { %1802 = vtanh.f32 %v414_v53  ;;  %v487_v54 = vpop.f32.mrb[4].mxu1  ;;  %v416_v55 = vpop.f32.mrb[5].mxu0 }
 0x109   : > { %1804 = vtanh.f32 %v487_v54  ;;  %v489_v56 = vpop.f32.mrb[5].mxu1  ;;  %v418_v57 = vpop.f32.mrb[6].mxu0 }
 0x10a   : > { %v1787_v58 = vpop.eup %1786  ;;  %1806 = vtanh.f32 %v416_v55  ;;  %v491_v59 = vpop.f32.mrb[6].mxu1 }
 0x10b   : > { %v420_v60 = vpop.f32.mrb[7].mxu0  ;;  %v1789_v61 = vpop.eup %1788  ;;  %1808 = vtanh.f32 %v489_v56 }
 0x10c   : > { %v493_v62 = vpop.f32.mrb[7].mxu1  ;;  %v1791_v63 = vpop.eup %1790  ;;  %1810 = vtanh.f32 %v418_v57 }
 0x10d   : > { %v1793_v0 = vpop.eup %1792  ;;  %1812 = vtanh.f32 %v491_v59 }
 0x10e   : > { %v1795_v1 = vpop.eup %1794  ;;  %1814 = vtanh.f32 %v420_v60 }
 0x10f   : > { %v1797_v2 = vpop.eup %1796  ;;  %1816 = vtanh.f32 %v493_v62  ;;  %v424_v3 = vpop.f32.mrb[8].mxu0  ;;  %v552_v4 = vpack.c.bf16 %v1795_v1, %v1787_v58 }
 0x110   : > { %v1799_v5 = vpop.eup %1798  ;;  %1818 = vtanh.f32 %v424_v3  ;;  %v497_v6 = vpop.f32.mrb[8].mxu1  ;;  %v554_v8 = vpack.c.bf16 %v1797_v2, %v1789_v61 }
 0x111   : > { %v426_v7 = vpop.f32.mrb[9].mxu0  ;;  %v1801_v9 = vpop.eup %1800  ;;  %1820 = vtanh.f32 %v497_v6  ;;  %v553_v11 = vpack.c.bf16 %v1799_v5, %v1791_v63 }
 0x112   : > { %v499_v10 = vpop.f32.mrb[9].mxu1  ;;  %v428_v12 = vpop.f32.mrb[10].mxu0  ;;  %1822 = vtanh.f32 %v426_v7  ;;  %v555_v14 = vpack.c.bf16 %v1801_v9, %v1793_v0 }
 0x113   : > { %v1803_v13 = vpop.eup %1802  ;;  %v501_v15 = vpop.f32.mrb[10].mxu1  ;;  %1824 = vtanh.f32 %v499_v10  ;;  %585 = vmatprep.subr.bf16.mxu0 %v553_v11 }
 0x114   : > { %v430_v20 = vpop.f32.mrb[11].mxu0  ;;  %v1805_v24 = vpop.eup %1804  ;;  %638 = vmatprep.subr.bf16.mxu1 %v555_v14  ;;  %1826 = vtanh.f32 %v428_v12  ;;  %586 = vmatpush1.bf16.msra.mxu0 %v552_v4  ;;  %v1772_v14 = vld [vmem:[%s2403_s3] sm:$0xff]  }
 0x115   : > { %v503_v25 = vpop.f32.mrb[11].mxu1  ;;  %v1807_v29 = vpop.eup %1806  ;;  %1828 = vtanh.f32 %v501_v15  ;;  %639 = vmatpush1.bf16.msra.mxu1 %v554_v8  ;;  %v1773_v15 = vld [vmem:[%s2403_s3 + $0x8] sm:$0xff]  }
 0x116   : > { %v1809_v33 = vpop.eup %1808  ;;  %1830 = vtanh.f32 %v430_v20 }
 0x117   : > { %v1811_v34 = vpop.eup %1810  ;;  %1832 = vtanh.f32 %v503_v25  ;;  %v434_v40 = vpop.f32.mrb[12].mxu0 }
 0x118   : > { %v1813_v38 = vpop.eup %1812  ;;  %v556_v41 = vpack.c.bf16 %v1811_v34, %v1803_v13  ;;  %1834 = vtanh.f32 %v434_v40  ;;  %v507_v43 = vpop.f32.mrb[12].mxu1 }
 0x119   : > { %v1815_v42 = vpop.eup %1814  ;;  %v436_v44 = vpop.f32.mrb[13].mxu0  ;;  %v558_v45 = vpack.c.bf16 %v1813_v38, %v1805_v24  ;;  %1836 = vtanh.f32 %v507_v43 }
 0x11a   : > { %v1817_v46 = vpop.eup %1816  ;;  %v509_v47 = vpop.f32.mrb[13].mxu1  ;;  %v557_v48 = vpack.c.bf16 %v1815_v42, %v1807_v29  ;;  %1838 = vtanh.f32 %v436_v44 }
 0x11b   : > { %v438_v49 = vpop.f32.mrb[14].mxu0  ;;  %v1819_v50 = vpop.eup %1818  ;;  %v559_v51 = vpack.c.bf16 %v1817_v46, %v1809_v33  ;;  %1840 = vtanh.f32 %v509_v47 }
 0x11c   : > { %v511_v52 = vpop.f32.mrb[14].mxu1  ;;  %v440_v53 = vpop.f32.mrb[15].mxu0  ;;  %587 = vmatprep.subr.bf16.mxu0 %v557_v48  ;;  %1842 = vtanh.f32 %v438_v49 }
 0x11d   : > { %v1821_v54 = vpop.eup %1820  ;;  %v513_v55 = vpop.f32.mrb[15].mxu1  ;;  %640 = vmatprep.subr.bf16.mxu1 %v559_v51  ;;  %588 = vmatpush1.bf16.msra.mxu0 %v556_v41  ;;  %1844 = vtanh.f32 %v511_v52 }
 0x11e   : > { %v1823_v56 = vpop.eup %1822  ;;  %641 = vmatpush1.bf16.msra.mxu1 %v558_v45  ;;  %1846 = vtanh.f32 %v440_v53 }
 0x11f   : > { %v1825_v57 = vpop.eup %1824  ;;  %1848 = vtanh.f32 %v513_v55 }
 0x120   : > { %v1827_v58 = vpop.eup %1826 }
 0x121   : > { %v1829_v59 = vpop.eup %1828  ;;  %v560_v60 = vpack.c.bf16 %v1827_v58, %v1819_v50 }
 0x122   : > { %v1831_v61 = vpop.eup %1830  ;;  %v562_v62 = vpack.c.bf16 %v1829_v59, %v1821_v54 }
 0x123   : > { %v1833_v63 = vpop.eup %1832  ;;  %v561_v0 = vpack.c.bf16 %v1831_v61, %v1823_v56 }
 0x124   : > { %v1835_v1 = vpop.eup %1834  ;;  %v563_v2 = vpack.c.bf16 %v1833_v63, %v1825_v57 }
 0x125   : > { %v1837_v3 = vpop.eup %1836  ;;  %589 = vmatprep.subr.bf16.mxu0 %v561_v0 }
 0x126   : > { %v1839_v4 = vpop.eup %1838  ;;  %642 = vmatprep.subr.bf16.mxu1 %v563_v2  ;;  %590 = vmatpush1.bf16.msra.mxu0 %v560_v60 }
 0x127   : > { %v1841_v5 = vpop.eup %1840  ;;  %643 = vmatpush1.bf16.msra.mxu1 %v562_v62 }
 0x128   : > { %v1843_v6 = vpop.eup %1842 }
 0x129   : > { %v1845_v7 = vpop.eup %1844  ;;  %v564_v8 = vpack.c.bf16 %v1843_v6, %v1835_v1 }
 0x12a   : > { %v1847_v9 = vpop.eup %1846  ;;  %v566_v10 = vpack.c.bf16 %v1845_v7, %v1837_v3 }
 0x12b   : > { %v1849_v11 = vpop.eup %1848  ;;  %v565_v12 = vpack.c.bf16 %v1847_v9, %v1839_v4  ;;  %v1774_v9 = vld [vmem:[%s2404_s4] sm:$0xff]  }
 0x12c   : > { %v567_v13 = vpack.c.bf16 %v1849_v11, %v1841_v5  ;;  %v1776_v11 = vld [vmem:[%s2404_s4 + $0x10] sm:$0xff]  }
 0x12d   : > { %591 = vmatprep.subr.bf16.mxu0 %v565_v12  ;;  %v1777_v12 = vld [vmem:[%s2404_s4 + $0x18] sm:$0xff]  }
 0x12e   : > { %644 = vmatprep.subr.bf16.mxu1 %v567_v13  ;;  %592 = vmatpush1.bf16.msra.mxu0 %v564_v8 }
 0x12f   : > { %645 = vmatpush1.bf16.msra.mxu1 %v566_v10  ;;  %v1775_v10 = vld [vmem:[%s2404_s4 + $0x8] sm:$0xff]  }
 0x131   : > { %1631 = vmatmul.mubr.msk.bf16.vlgmr.msra.gmra.mrb[16].mxu0 %vm578_vm1, %v1772_v14 }
 0x132   : > { %1633 = vmatmul.mubr.msk.bf16.vlgmr.msra.gmra.mrb[16].mxu1 %vm578_vm1, %v1772_v14  ;;  %627 = vmatprep.mubr.bf16.mxu0 %v1986_v16 }
 0x133   : > { %680 = vmatprep.mubr.bf16.mxu1 %v1986_v16 }
 0x139   : > { %1632 = vmatmul.mubr.msk.bf16.gmra.mrb[20].mxu0 %vm578_vm1, %v1773_v15 }
 0x13a   : > { %1634 = vmatmul.mubr.msk.bf16.gmra.mrb[20].mxu1 %vm578_vm1, %v1773_v15  ;;  %787 = vmatprep.mubr.bf16.mxu0 %v1986_v16 }
 0x13b   : > { %860 = vmatprep.mubr.bf16.mxu1 %v1986_v16 }
 0x204   : > { %v619_v20 = vpop.f32.mrb[16].mxu0 }
 0x205   : > { %1850 = vtanh.f32 %v619_v20  ;;  %v672_v24 = vpop.f32.mrb[16].mxu1  ;;  %v621_v25 = vpop.f32.mrb[17].mxu0 }
 0x206   : > { %1852 = vtanh.f32 %v672_v24  ;;  %v674_v29 = vpop.f32.mrb[17].mxu1  ;;  %v623_v33 = vpop.f32.mrb[18].mxu0 }
 0x207   : > { %1854 = vtanh.f32 %v621_v25  ;;  %v676_v34 = vpop.f32.mrb[18].mxu1  ;;  %v625_v38 = vpop.f32.mrb[19].mxu0 }
 0x208   : > { %1856 = vtanh.f32 %v674_v29  ;;  %v678_v40 = vpop.f32.mrb[19].mxu1 }
 0x209   : > { %1858 = vtanh.f32 %v623_v33 }
 0x20a   : > { %1860 = vtanh.f32 %v676_v34 }
 0x20b   : > { %1862 = vtanh.f32 %v625_v38 }
 0x20c   : > { %1864 = vtanh.f32 %v678_v40  ;;  %v629_v41 = vpop.f32.mrb[20].mxu0 }
 0x20d   : > { %1866 = vtanh.f32 %v629_v41  ;;  %v682_v42 = vpop.f32.mrb[20].mxu1  ;;  %v631_v43 = vpop.f32.mrb[21].mxu0 }
 0x20e   : > { %1868 = vtanh.f32 %v682_v42  ;;  %v684_v44 = vpop.f32.mrb[21].mxu1  ;;  %v633_v45 = vpop.f32.mrb[22].mxu0 }
 0x20f   : > { %v1851_v46 = vpop.eup %1850  ;;  %1870 = vtanh.f32 %v631_v43  ;;  %v686_v47 = vpop.f32.mrb[22].mxu1 }
 0x210   : > { %v635_v48 = vpop.f32.mrb[23].mxu0  ;;  %v1853_v49 = vpop.eup %1852  ;;  %1872 = vtanh.f32 %v684_v44 }
 0x211   : > { %v688_v50 = vpop.f32.mrb[23].mxu1  ;;  %v1855_v51 = vpop.eup %1854  ;;  %1874 = vtanh.f32 %v633_v45 }
 0x212   : > { %v1857_v52 = vpop.eup %1856  ;;  %1876 = vtanh.f32 %v686_v47 }
 0x213   : > { %v1859_v53 = vpop.eup %1858  ;;  %1878 = vtanh.f32 %v635_v48 }
 0x214   : > { %v1861_v54 = vpop.eup %1860  ;;  %1880 = vtanh.f32 %v688_v50  ;;  %v715_v55 = vpack.c.bf16 %v1859_v53, %v1851_v46 }
 0x215   : > { %v1863_v56 = vpop.eup %1862  ;;  %v717_v57 = vpack.c.bf16 %v1861_v54, %v1853_v49 }
 0x216   : > { %v1865_v58 = vpop.eup %1864  ;;  %v716_v59 = vpack.c.bf16 %v1863_v56, %v1855_v51 }
 0x217   : > { %v1867_v60 = vpop.eup %1866  ;;  %v718_v61 = vpack.c.bf16 %v1865_v58, %v1857_v52 }
 0x218   : > { %v1869_v62 = vpop.eup %1868  ;;  %755 = vmatprep.subr.bf16.mxu0 %v716_v59 }
 0x219   : > { %v1871_v63 = vpop.eup %1870  ;;  %828 = vmatprep.subr.bf16.mxu1 %v718_v61  ;;  %756 = vmatpush1.bf16.msra.mxu0 %v715_v55 }
 0x21a   : > { %v1873_v0 = vpop.eup %1872  ;;  %829 = vmatpush1.bf16.msra.mxu1 %v717_v57 }
 0x21b   : > { %v1875_v1 = vpop.eup %1874 }
 0x21c   : > { %v1877_v2 = vpop.eup %1876  ;;  %v719_v3 = vpack.c.bf16 %v1875_v1, %v1867_v60 }
 0x21d   : > { %v1879_v4 = vpop.eup %1878  ;;  %v721_v5 = vpack.c.bf16 %v1877_v2, %v1869_v62 }
 0x21e   : > { %v1881_v6 = vpop.eup %1880  ;;  %v720_v7 = vpack.c.bf16 %v1879_v4, %v1871_v63 }
 0x21f   : > { %v722_v8 = vpack.c.bf16 %v1881_v6, %v1873_v0 }
 0x220   : > { %757 = vmatprep.subr.bf16.mxu0 %v720_v7 }
 0x221   : > { %830 = vmatprep.subr.bf16.mxu1 %v722_v8  ;;  %758 = vmatpush1.bf16.msra.mxu0 %v719_v3 }
 0x222   : > { %831 = vmatpush1.bf16.msra.mxu1 %v721_v5 }
 0x224   : > { %1639 = vmatmul.mubr.msk.bf16.vlgmr.msra.gmra.mrb[24].mxu0 %vm357_vm0, %v1774_v9 }
 0x225   : > { %1643 = vmatmul.mubr.msk.bf16.vlgmr.msra.gmra.mrb[24].mxu1 %vm357_vm0, %v1774_v9  ;;  %797 = vmatprep.mubr.bf16.mxu0 %v1986_v16 }
 0x226   : > { %870 = vmatprep.mubr.bf16.mxu1 %v1986_v16 }
 0x22c   : > { %1640 = vmatmul.mubr.msk.bf16.gmra.mrb[28].mxu0 %vm357_vm0, %v1775_v10 }
 0x22d   : > { %1644 = vmatmul.mubr.msk.bf16.gmra.mrb[28].mxu1 %vm357_vm0, %v1775_v10  ;;  %807 = vmatprep.mubr.bf16.mxu0 %v1986_v16 }
 0x22e   : > { %880 = vmatprep.mubr.bf16.mxu1 %v1986_v16 }
 0x234   : > { %1641 = vmatmul.mubr.msk.bf16.gmra.mrb[32].mxu0 %vm357_vm0, %v1776_v11 }
 0x235   : > { %1645 = vmatmul.mubr.msk.bf16.gmra.mrb[32].mxu1 %vm357_vm0, %v1776_v11  ;;  %817 = vmatprep.mubr.bf16.mxu0 %v1986_v16 }
 0x236   : > { %890 = vmatprep.mubr.bf16.mxu1 %v1986_v16 }
 0x23c   : > { %1642 = vmatmul.mubr.msk.bf16.gmra.mrb[36].mxu0 %vm357_vm0, %v1777_v12 }
 0x23d   : > { %1646 = vmatmul.mubr.msk.bf16.gmra.mrb[36].mxu1 %vm357_vm0, %v1777_v12  ;;  %1061 = vmatprep.mubr.bf16.mxu0 %v1986_v16 }
 0x23e   : > { %1174 = vmatprep.mubr.bf16.mxu1 %v1986_v16 }
 0x2f7   : > { %v789_v13 = vpop.f32.mrb[24].mxu0 }
 0x2f8   : > { %1882 = vtanh.f32 %v789_v13  ;;  %v862_v14 = vpop.f32.mrb[24].mxu1  ;;  %v791_v15 = vpop.f32.mrb[25].mxu0 }
 0x2f9   : > { %1884 = vtanh.f32 %v862_v14  ;;  %v864_v20 = vpop.f32.mrb[25].mxu1  ;;  %v793_v24 = vpop.f32.mrb[26].mxu0 }
 0x2fa   : > { %1886 = vtanh.f32 %v791_v15  ;;  %v866_v25 = vpop.f32.mrb[26].mxu1  ;;  %v795_v29 = vpop.f32.mrb[27].mxu0 }
 0x2fb   : > { %1888 = vtanh.f32 %v864_v20  ;;  %v868_v33 = vpop.f32.mrb[27].mxu1 }
 0x2fc   : > { %1890 = vtanh.f32 %v793_v24 }
 0x2fd   : > { %1892 = vtanh.f32 %v866_v25 }
 0x2fe   : > { %1894 = vtanh.f32 %v795_v29 }
 0x2ff   : > { %1896 = vtanh.f32 %v868_v33  ;;  %v799_v34 = vpop.f32.mrb[28].mxu0 }
 0x300   : > { %1898 = vtanh.f32 %v799_v34  ;;  %v872_v38 = vpop.f32.mrb[28].mxu1  ;;  %v801_v40 = vpop.f32.mrb[29].mxu0 }
 0x301   : > { %1900 = vtanh.f32 %v872_v38  ;;  %v874_v41 = vpop.f32.mrb[29].mxu1  ;;  %v803_v42 = vpop.f32.mrb[30].mxu0 }
 0x302   : > { %v1883_v43 = vpop.eup %1882  ;;  %1902 = vtanh.f32 %v801_v40  ;;  %v876_v44 = vpop.f32.mrb[30].mxu1 }
 0x303   : > { %v805_v45 = vpop.f32.mrb[31].mxu0  ;;  %v1885_v46 = vpop.eup %1884  ;;  %1904 = vtanh.f32 %v874_v41 }
 0x304   : > { %v878_v47 = vpop.f32.mrb[31].mxu1  ;;  %v1887_v48 = vpop.eup %1886  ;;  %1906 = vtanh.f32 %v803_v42 }
 0x305   : > { %v1889_v49 = vpop.eup %1888  ;;  %1908 = vtanh.f32 %v876_v44 }
 0x306   : > { %v1891_v50 = vpop.eup %1890  ;;  %1910 = vtanh.f32 %v805_v45 }
 0x307   : > { %v1893_v51 = vpop.eup %1892  ;;  %1912 = vtanh.f32 %v878_v47  ;;  %v809_v52 = vpop.f32.mrb[32].mxu0  ;;  %v949_v53 = vpack.c.bf16 %v1891_v50, %v1883_v43 }
 0x308   : > { %v1895_v54 = vpop.eup %1894  ;;  %1914 = vtanh.f32 %v809_v52  ;;  %v882_v55 = vpop.f32.mrb[32].mxu1  ;;  %v951_v57 = vpack.c.bf16 %v1893_v51, %v1885_v46 }
 0x309   : > { %v811_v56 = vpop.f32.mrb[33].mxu0  ;;  %v1897_v58 = vpop.eup %1896  ;;  %1916 = vtanh.f32 %v882_v55  ;;  %v950_v60 = vpack.c.bf16 %v1895_v54, %v1887_v48 }
 0x30a   : > { %v884_v59 = vpop.f32.mrb[33].mxu1  ;;  %v813_v61 = vpop.f32.mrb[34].mxu0  ;;  %1918 = vtanh.f32 %v811_v56  ;;  %v952_v63 = vpack.c.bf16 %v1897_v58, %v1889_v49 }
 0x30b   : > { %v1899_v62 = vpop.eup %1898  ;;  %v886_v0 = vpop.f32.mrb[34].mxu1  ;;  %1920 = vtanh.f32 %v884_v59  ;;  %1029 = vmatprep.subr.bf16.mxu0 %v950_v60 }
 0x30c   : > { %v815_v1 = vpop.f32.mrb[35].mxu0  ;;  %v1901_v2 = vpop.eup %1900  ;;  %1142 = vmatprep.subr.bf16.mxu1 %v952_v63  ;;  %1922 = vtanh.f32 %v813_v61  ;;  %1030 = vmatpush1.bf16.msra.mxu0 %v949_v53  ;;  %v1778_v63 = vld [vmem:[%s2405_s5] sm:$0xff]  }
 0x30d   : > { %v888_v3 = vpop.f32.mrb[35].mxu1  ;;  %v1903_v4 = vpop.eup %1902  ;;  %1924 = vtanh.f32 %v886_v0  ;;  %1143 = vmatpush1.bf16.msra.mxu1 %v951_v57  ;;  %v1779_v0 = vld [vmem:[%s2405_s5 + $0x8] sm:$0xff]  }
 0x30e   : > { %v1905_v5 = vpop.eup %1904  ;;  %1926 = vtanh.f32 %v815_v1  ;;  %v1780_v1 = vld [vmem:[%s2405_s5 + $0x10] sm:$0xff]  }
 0x30f   : > { %v1907_v6 = vpop.eup %1906  ;;  %1928 = vtanh.f32 %v888_v3  ;;  %v819_v8 = vpop.f32.mrb[36].mxu0  ;;  %v1782_v3 = vld [vmem:[%s2405_s5 + $0x20] sm:$0xff]  }
 0x310   : > { %v1909_v7 = vpop.eup %1908  ;;  %v953_v9 = vpack.c.bf16 %v1907_v6, %v1899_v62  ;;  %1930 = vtanh.f32 %v819_v8  ;;  %v892_v11 = vpop.f32.mrb[36].mxu1  ;;  %v1785_v6 = vld [vmem:[%s2405_s5 + $0x38] sm:$0xff]  }
 0x311   : > { %v1911_v10 = vpop.eup %1910  ;;  %v821_v12 = vpop.f32.mrb[37].mxu0  ;;  %v955_v13 = vpack.c.bf16 %v1909_v7, %v1901_v2  ;;  %1932 = vtanh.f32 %v892_v11  ;;  %v1781_v2 = vld [vmem:[%s2405_s5 + $0x18] sm:$0xff]   ;;  %v1987_v7 = vmov 0.0  }
 0x312   : > { %v1913_v14 = vpop.eup %1912  ;;  %v894_v15 = vpop.f32.mrb[37].mxu1  ;;  %v954_v20 = vpack.c.bf16 %v1911_v10, %v1903_v4  ;;  %1934 = vtanh.f32 %v821_v12  ;;  %v1783_v4 = vld [vmem:[%s2405_s5 + $0x28] sm:$0xff]  }
 0x313   : > { %v823_v24 = vpop.f32.mrb[38].mxu0  ;;  %v1915_v25 = vpop.eup %1914  ;;  %v956_v29 = vpack.c.bf16 %v1913_v14, %v1905_v5  ;;  %1936 = vtanh.f32 %v894_v15  ;;  %v1784_v5 = vld [vmem:[%s2405_s5 + $0x30] sm:$0xff]  }
 0x314   : > { %v896_v33 = vpop.f32.mrb[38].mxu1  ;;  %v825_v34 = vpop.f32.mrb[39].mxu0  ;;  %1031 = vmatprep.subr.bf16.mxu0 %v954_v20  ;;  %1938 = vtanh.f32 %v823_v24 }
 0x315   : > { %v1917_v38 = vpop.eup %1916  ;;  %v898_v40 = vpop.f32.mrb[39].mxu1  ;;  %1144 = vmatprep.subr.bf16.mxu1 %v956_v29  ;;  %1032 = vmatpush1.bf16.msra.mxu0 %v953_v9  ;;  %1940 = vtanh.f32 %v896_v33 }
 0x316   : > { %v1919_v41 = vpop.eup %1918  ;;  %1145 = vmatpush1.bf16.msra.mxu1 %v955_v13  ;;  %1942 = vtanh.f32 %v825_v34 }
 0x317   : > { %v1921_v42 = vpop.eup %1920  ;;  %1944 = vtanh.f32 %v898_v40 }
 0x318   : > { %v1923_v43 = vpop.eup %1922 }
 0x319   : > { %v1925_v44 = vpop.eup %1924  ;;  %v957_v45 = vpack.c.bf16 %v1923_v43, %v1915_v25 }
 0x31a   : > { %v1927_v46 = vpop.eup %1926  ;;  %v959_v47 = vpack.c.bf16 %v1925_v44, %v1917_v38 }
 0x31b   : > { %v1929_v48 = vpop.eup %1928  ;;  %v958_v49 = vpack.c.bf16 %v1927_v46, %v1919_v41 }
 0x31c   : > { %v1931_v50 = vpop.eup %1930  ;;  %v960_v51 = vpack.c.bf16 %v1929_v48, %v1921_v42 }
 0x31d   : > { %v1933_v52 = vpop.eup %1932  ;;  %1033 = vmatprep.subr.bf16.mxu0 %v958_v49 }
 0x31e   : > { %v1935_v53 = vpop.eup %1934  ;;  %1146 = vmatprep.subr.bf16.mxu1 %v960_v51  ;;  %1034 = vmatpush1.bf16.msra.mxu0 %v957_v45 }
 0x31f   : > { %v1937_v54 = vpop.eup %1936  ;;  %1147 = vmatpush1.bf16.msra.mxu1 %v959_v47 }
 0x320   : > { %v1939_v55 = vpop.eup %1938 }
 0x321   : > { %v1941_v56 = vpop.eup %1940  ;;  %v961_v57 = vpack.c.bf16 %v1939_v55, %v1931_v50 }
 0x322   : > { %v1943_v58 = vpop.eup %1942  ;;  %v963_v59 = vpack.c.bf16 %v1941_v56, %v1933_v52 }
 0x323   : > { %v1945_v60 = vpop.eup %1944  ;;  %v962_v61 = vpack.c.bf16 %v1943_v58, %v1935_v53 }
 0x324   : > { %v964_v62 = vpack.c.bf16 %v1945_v60, %v1937_v54 }
 0x325   : > { %1035 = vmatprep.subr.bf16.mxu0 %v962_v61 }
 0x326   : > { %1148 = vmatprep.subr.bf16.mxu1 %v964_v62  ;;  %1036 = vmatpush1.bf16.msra.mxu0 %v961_v57 }
 0x327   : > { %1149 = vmatpush1.bf16.msra.mxu1 %v963_v59 }
 0x329   : > { %1655 = vmatmul.mubr.msk.bf16.vlgmr.msra.gmra.mrb[40].mxu0 %vm578_vm1, %v1778_v63 }
 0x32a   : > { %1663 = vmatmul.mubr.msk.bf16.vlgmr.msra.gmra.mrb[40].mxu1 %vm578_vm1, %v1778_v63  ;;  %1071 = vmatprep.mubr.bf16.mxu0 %v1986_v16 }
 0x32b   : > { %1184 = vmatprep.mubr.bf16.mxu1 %v1986_v16 }
 0x331   : > { %1656 = vmatmul.mubr.msk.bf16.gmra.mrb[44].mxu0 %vm578_vm1, %v1779_v0 }
 0x332   : > { %1664 = vmatmul.mubr.msk.bf16.gmra.mrb[44].mxu1 %vm578_vm1, %v1779_v0  ;;  %1081 = vmatprep.mubr.bf16.mxu0 %v1986_v16 }
 0x333   : > { %1194 = vmatprep.mubr.bf16.mxu1 %v1986_v16 }
 0x339   : > { %1657 = vmatmul.mubr.msk.bf16.gmra.mrb[48].mxu0 %vm578_vm1, %v1780_v1 }
 0x33a   : > { %1665 = vmatmul.mubr.msk.bf16.gmra.mrb[48].mxu1 %vm578_vm1, %v1780_v1  ;;  %1091 = vmatprep.mubr.bf16.mxu0 %v1986_v16 }
 0x33b   : > { %1204 = vmatprep.mubr.bf16.mxu1 %v1986_v16 }
 0x341   : > { %1658 = vmatmul.mubr.msk.bf16.gmra.mrb[52].mxu0 %vm578_vm1, %v1781_v2 }
 0x342   : > { %1666 = vmatmul.mubr.msk.bf16.gmra.mrb[52].mxu1 %vm578_vm1, %v1781_v2  ;;  %1101 = vmatprep.mubr.bf16.mxu0 %v1986_v16  ;;  %v2287_v2 = vld [vmem:[%s2080_s14] sm:$0xff] }
 0x343   : > { %1214 = vmatprep.mubr.bf16.mxu1 %v1986_v16 }
 0x349   : > { %1659 = vmatmul.mubr.msk.bf16.gmra.mrb[56].mxu0 %vm578_vm1, %v1782_v3 }
 0x34a   : > { %1667 = vmatmul.mubr.msk.bf16.gmra.mrb[56].mxu1 %vm578_vm1, %v1782_v3  ;;  %1111 = vmatprep.mubr.bf16.mxu0 %v1986_v16 }
 0x34b   : > { %1224 = vmatprep.mubr.bf16.mxu1 %v1986_v16 }
 0x351   : > { %1660 = vmatmul.mubr.msk.bf16.gmra.mrb[60].mxu0 %vm578_vm1, %v1783_v4 }
 0x352   : > { %1668 = vmatmul.mubr.msk.bf16.gmra.mrb[60].mxu1 %vm578_vm1, %v1783_v4  ;;  %1121 = vmatprep.mubr.bf16.mxu0 %v1986_v16 }
 0x353   : > { %1234 = vmatprep.mubr.bf16.mxu1 %v1986_v16 }
 0x359   : > { %1661 = vmatmul.mubr.msk.bf16.gmra.mrb[64].mxu0 %vm578_vm1, %v1784_v5 }
 0x35a   : > { %1669 = vmatmul.mubr.msk.bf16.gmra.mrb[64].mxu1 %vm578_vm1, %v1784_v5  ;;  %1131 = vmatprep.mubr.bf16.mxu0 %v1986_v16 }
 0x35b   : > { %1244 = vmatprep.mubr.bf16.mxu1 %v1986_v16 }
 0x361   : > { %1662 = vmatmul.mubr.msk.bf16.gmra.mrb[68].mxu0 %vm578_vm1, %v1785_v6 }
 0x362   : > { %1670 = vmatmul.mubr.msk.bf16.gmra.mrb[68].mxu1 %vm578_vm1, %v1785_v6  ;;  %1448 = vmatprep.mubr.f32.mxu0 %v1987_v7 }
 0x363   : > { %1519 = vmatprep.mubr.f32.mxu1 %v1987_v7  ;;  %v2295_v7 = vld [vmem:[%s2080_s14 + $0x8] sm:$0xff] }
 0x3fc   : > { %v1063_v8 = vpop.f32.mrb[40].mxu0 }
 0x3fd   : > { %v1255_v9 = vsub.f32 %v1063_v8, %v2097_v22  ;;  %v1176_v10 = vpop.f32.mrb[40].mxu1  ;;  %v1065_v11 = vpop.f32.mrb[41].mxu0 }
 0x3fe   : > { %v1257_v12 = vsub.f32 %v1176_v10, %v2107_v26  ;;  %v1256_v16 = vsub.f32 %v1065_v11, %v2083_v17  ;;  %v1178_v13 = vpop.f32.mrb[41].mxu1  ;;  %v1067_v14 = vpop.f32.mrb[42].mxu0  ;;  %v2299_v11 = vld [vmem:[%s2080_s14 + $0x18] sm:$0xff] }
 0x3ff   : > { %v1258_v15 = vsub.f32 %v1178_v13, %v2089_v19  ;;  %v1259_v20 = vsub.f32 %v1067_v14, %v2100_v23  ;;  %v1180_v24 = vpop.f32.mrb[42].mxu1  ;;  %v1069_v25 = vpop.f32.mrb[43].mxu0  ;;  %v1319_v38 = vmul.f32 %v1255_v9, %v1255_v9 }
 0x400   : > { %v1321_v29 = vmul.f32 %v1257_v12, %v1257_v12  ;;  %v1261_v33 = vsub.f32 %v1180_v24, %v2110_v27  ;;  %v1260_v34 = vsub.f32 %v1069_v25, %v2086_v18  ;;  %v1182_v22 = vpop.f32.mrb[43].mxu1  ;;  %v1320_v41 = vmul.f32 %v1256_v16, %v1256_v16  ;;  %v2303_v16 = vld [vmem:[%s2080_s14 + $0x20] sm:$0xff]  ;;  %v2307_v24 = vld [vmem:[%s2080_s14 + $0x30] sm:$0xff] }
 0x401   : > { %v1323_v40 = vmul.f32 %v1259_v20, %v1259_v20  ;;  %v1262_v26 = vsub.f32 %v1182_v22, %v2094_v21  ;;  %v1322_v43 = vmul.f32 %v1258_v15, %v1258_v15 }
 0x402   : > { %v1325_v17 = vmul.f32 %v1261_v33, %v1261_v33  ;;  %v1324_v42 = vmul.f32 %v1260_v34, %v1260_v34 }
 0x403   : > { %v1680_v44 = vpack.c.bf16 %v1323_v40, %v1319_v38  ;;  %v1326_v19 = vmul.f32 %v1262_v26, %v1262_v26  ;;  %v2315_v40 = vld [vmem:[%s2080_s14 + $0x38] sm:$0xff] }
 0x404   : > { %v1712_v45 = vpack.c.bf16 %v1325_v17, %v1321_v29  ;;  %v1678_v23 = vpack.c.bf16 %v1324_v42, %v1320_v41  ;;  %v1073_v46 = vpop.f32.mrb[44].mxu0  ;;  %v2311_v29 = vld [vmem:[%s2080_s14 + $0x28] sm:$0xff] }
 0x405   : > { %v1710_v47 = vpack.c.bf16 %v1326_v19, %v1322_v43  ;;  %v1263_v48 = vsub.f32 %v1073_v46, %v2131_v35  ;;  %v1186_v27 = vpop.f32.mrb[44].mxu1  ;;  %v1075_v49 = vpop.f32.mrb[45].mxu0 }
 0x406   : > { %v1265_v18 = vsub.f32 %v1186_v27, %v2137_v37  ;;  %v1264_v50 = vsub.f32 %v1075_v49, %v2113_v28  ;;  %v1188_v51 = vpop.f32.mrb[45].mxu1  ;;  %v1077_v21 = vpop.f32.mrb[46].mxu0  ;;  %1679 = vmatprep.subr.bf16.mxu0 %v1678_v23 }
 0x407   : > { %v1266_v52 = vsub.f32 %v1188_v51, %v2121_v31  ;;  %v1267_v53 = vsub.f32 %v1077_v21, %v2134_v36  ;;  %v1190_v54 = vpop.f32.mrb[46].mxu1  ;;  %1711 = vmatprep.subr.bf16.mxu1 %v1710_v47  ;;  %v1079_v55 = vpop.f32.mrb[47].mxu0  ;;  %1681 = vmatpush1.bf16.msra.mxu0 %v1680_v44  ;;  %v1327_v28 = vmul.f32 %v1263_v48, %v1263_v48  ;;  %v2319_v48 = vld [vmem:[%s2080_s14 + $0x40] sm:$0xff]  ;;  %v2327_v21 = vld [vmem:[%s2080_s14 + $0x48] sm:$0xff] }
 0x408   : > { %v1329_v56 = vmul.f32 %v1265_v18, %v1265_v18  ;;  %v1269_v35 = vsub.f32 %v1190_v54, %v2142_v39  ;;  %v1268_v57 = vsub.f32 %v1079_v55, %v2118_v30  ;;  %v1192_v37 = vpop.f32.mrb[47].mxu1  ;;  %1713 = vmatpush1.bf16.msra.mxu1 %v1712_v45  ;;  %v1328_v31 = vmul.f32 %v1264_v50, %v1264_v50  ;;  %v2323_v50 = vld [vmem:[%s2080_s14 + $0x50] sm:$0xff]  ;;  %v2331_v55 = vld [vmem:[%s2080_s14 + $0x58] sm:$0xff] }
 0x409   : > { %v1331_v58 = vmul.f32 %v1267_v53, %v1267_v53  ;;  %v1270_v59 = vsub.f32 %v1192_v37, %v2124_v32  ;;  %v1330_v61 = vmul.f32 %v1266_v52, %v1266_v52  ;;  %v2291_v32 = vld [vmem:[%s2080_s14 + $0x10] sm:$0xff] }
 0x40a   : > { %v1333_v36 = vmul.f32 %v1269_v35, %v1269_v35  ;;  %v1332_v60 = vmul.f32 %v1268_v57, %v1268_v57  ;;  %v2335_v35 = vld [vmem:[%s2080_s14 + $0x60] sm:$0xff] }
 0x40b   : > { %v1684_v62 = vpack.c.bf16 %v1331_v58, %v1327_v28  ;;  %v1334_v63 = vmul.f32 %v1270_v59, %v1270_v59  ;;  %v2339_v59 = vld [vmem:[%s2080_s14 + $0x70] sm:$0xff] }
 0x40c   : > { %v1716_v0 = vpack.c.bf16 %v1333_v36, %v1329_v56  ;;  %v1682_v39 = vpack.c.bf16 %v1332_v60, %v1328_v31  ;;  %v1083_v30 = vpop.f32.mrb[48].mxu0  ;;  %v2343_v36 = vld [vmem:[%s2080_s14 + $0x68] sm:$0xff] }
 0x40d   : > { %v1714_v1 = vpack.c.bf16 %v1334_v63, %v1330_v61  ;;  %v1271_v3 = vsub.f32 %v1083_v30, %v2287_v2  ;;  %v1196_v4 = vpop.f32.mrb[48].mxu1  ;;  %v1085_v5 = vpop.f32.mrb[49].mxu0 }
 0x40e   : > { %v1273_v6 = vsub.f32 %v1196_v4, %v2291_v32  ;;  %v1272_v8 = vsub.f32 %v1085_v5, %v2295_v7  ;;  %v1198_v9 = vpop.f32.mrb[49].mxu1  ;;  %v1087_v10 = vpop.f32.mrb[50].mxu0  ;;  %1683 = vmatprep.subr.bf16.mxu0 %v1682_v39 }
 0x40f   : > { %v1274_v12 = vsub.f32 %v1198_v9, %v2299_v11  ;;  %v1275_v13 = vsub.f32 %v1087_v10, %v2303_v16  ;;  %v1200_v14 = vpop.f32.mrb[50].mxu1  ;;  %1715 = vmatprep.subr.bf16.mxu1 %v1714_v1  ;;  %v1089_v15 = vpop.f32.mrb[51].mxu0  ;;  %1685 = vmatpush1.bf16.msra.mxu0 %v1684_v62  ;;  %v1335_v22 = vmul.f32 %v1271_v3, %v1271_v3 }
 0x410   : > { %v1337_v20 = vmul.f32 %v1273_v6, %v1273_v6  ;;  %v1277_v25 = vsub.f32 %v1200_v14, %v2307_v24  ;;  %v1276_v33 = vsub.f32 %v1089_v15, %v2311_v29  ;;  %v1202_v34 = vpop.f32.mrb[51].mxu1  ;;  %1717 = vmatpush1.bf16.msra.mxu1 %v1716_v0  ;;  %v1336_v41 = vmul.f32 %v1272_v8, %v1272_v8  ;;  %v2347_v0 = vld [vmem:[%s2080_s14 + $0x78] sm:$0xff] }
 0x411   : > { %v1339_v38 = vmul.f32 %v1275_v13, %v1275_v13  ;;  %v1278_v26 = vsub.f32 %v1202_v34, %v2315_v40  ;;  %v1338_v43 = vmul.f32 %v1274_v12, %v1274_v12 }
 0x412   : > { %v1341_v17 = vmul.f32 %v1277_v25, %v1277_v25  ;;  %v1340_v42 = vmul.f32 %v1276_v33, %v1276_v33 }
 0x413   : > { %v1688_v44 = vpack.c.bf16 %v1339_v38, %v1335_v22  ;;  %v1342_v19 = vmul.f32 %v1278_v26, %v1278_v26 }
 0x414   : > { %v1720_v45 = vpack.c.bf16 %v1341_v17, %v1337_v20  ;;  %v1686_v23 = vpack.c.bf16 %v1340_v42, %v1336_v41  ;;  %v1093_v46 = vpop.f32.mrb[52].mxu0 }
 0x415   : > { %v1718_v47 = vpack.c.bf16 %v1342_v19, %v1338_v43  ;;  %v1279_v27 = vsub.f32 %v1093_v46, %v2319_v48  ;;  %v1206_v49 = vpop.f32.mrb[52].mxu1  ;;  %v1095_v18 = vpop.f32.mrb[53].mxu0 }
 0x416   : > { %v1281_v51 = vsub.f32 %v1206_v49, %v2323_v50  ;;  %v1280_v52 = vsub.f32 %v1095_v18, %v2327_v21  ;;  %v1208_v53 = vpop.f32.mrb[53].mxu1  ;;  %v1097_v54 = vpop.f32.mrb[54].mxu0  ;;  %1687 = vmatprep.subr.bf16.mxu0 %v1686_v23 }
 0x417   : > { %v1282_v56 = vsub.f32 %v1208_v53, %v2331_v55  ;;  %v1283_v57 = vsub.f32 %v1097_v54, %v2335_v35  ;;  %v1210_v37 = vpop.f32.mrb[54].mxu1  ;;  %1719 = vmatprep.subr.bf16.mxu1 %v1718_v47  ;;  %v1099_v28 = vpop.f32.mrb[55].mxu0  ;;  %1689 = vmatpush1.bf16.msra.mxu0 %v1688_v44  ;;  %v1343_v62 = vmul.f32 %v1279_v27, %v1279_v27 }
 0x418   : > { %v1345_v58 = vmul.f32 %v1281_v51, %v1281_v51  ;;  %v1285_v31 = vsub.f32 %v1210_v37, %v2339_v59  ;;  %v1284_v60 = vsub.f32 %v1099_v28, %v2343_v36  ;;  %v1212_v61 = vpop.f32.mrb[55].mxu1  ;;  %1721 = vmatpush1.bf16.msra.mxu1 %v1720_v45  ;;  %v1344_v30 = vmul.f32 %v1280_v52, %v1280_v52 }
 0x419   : > { %v1347_v63 = vmul.f32 %v1283_v57, %v1283_v57  ;;  %v1286_v39 = vsub.f32 %v1212_v61, %v2347_v0  ;;  %v1346_v4 = vmul.f32 %v1282_v56, %v1282_v56 }
 0x41a   : > { %v1349_v1 = vmul.f32 %v1285_v31, %v1285_v31  ;;  %v1348_v3 = vmul.f32 %v1284_v60, %v1284_v60 }
 0x41b   : > { %v1692_v5 = vpack.c.bf16 %v1347_v63, %v1343_v62  ;;  %v1350_v6 = vmul.f32 %v1286_v39, %v1286_v39 }
 0x41c   : > { %v1724_v8 = vpack.c.bf16 %v1349_v1, %v1345_v58  ;;  %v1690_v9 = vpack.c.bf16 %v1348_v3, %v1344_v30  ;;  %v1103_v10 = vpop.f32.mrb[56].mxu0 }
 0x41d   : > { %v1722_v12 = vpack.c.bf16 %v1350_v6, %v1346_v4  ;;  %v1287_v13 = vsub.f32 %v1103_v10, %v2287_v2  ;;  %v1216_v14 = vpop.f32.mrb[56].mxu1  ;;  %v1105_v15 = vpop.f32.mrb[57].mxu0 }
 0x41e   : > { %v1289_v20 = vsub.f32 %v1216_v14, %v2291_v32  ;;  %v1288_v25 = vsub.f32 %v1105_v15, %v2295_v7  ;;  %v1218_v33 = vpop.f32.mrb[57].mxu1  ;;  %v1107_v34 = vpop.f32.mrb[58].mxu0  ;;  %1691 = vmatprep.subr.bf16.mxu0 %v1690_v9 }
 0x41f   : > { %v1290_v22 = vsub.f32 %v1218_v33, %v2299_v11  ;;  %v1291_v38 = vsub.f32 %v1107_v34, %v2303_v16  ;;  %v1220_v26 = vpop.f32.mrb[58].mxu1  ;;  %1723 = vmatprep.subr.bf16.mxu1 %v1722_v12  ;;  %v1109_v41 = vpop.f32.mrb[59].mxu0  ;;  %1693 = vmatpush1.bf16.msra.mxu0 %v1692_v5  ;;  %v1351_v19 = vmul.f32 %v1287_v13, %v1287_v13 }
 0x420   : > { %v1353_v17 = vmul.f32 %v1289_v20, %v1289_v20  ;;  %v1293_v42 = vsub.f32 %v1220_v26, %v2307_v24  ;;  %v1292_v43 = vsub.f32 %v1109_v41, %v2311_v29  ;;  %v1222_v44 = vpop.f32.mrb[59].mxu1  ;;  %1725 = vmatpush1.bf16.msra.mxu1 %v1724_v8  ;;  %v1352_v46 = vmul.f32 %v1288_v25, %v1288_v25 }
 0x421   : > { %v1355_v45 = vmul.f32 %v1291_v38, %v1291_v38  ;;  %v1294_v23 = vsub.f32 %v1222_v44, %v2315_v40  ;;  %v1354_v49 = vmul.f32 %v1290_v22, %v1290_v22 }
 0x422   : > { %v1357_v47 = vmul.f32 %v1293_v42, %v1293_v42  ;;  %v1356_v27 = vmul.f32 %v1292_v43, %v1292_v43 }
 0x423   : > { %v1696_v18 = vpack.c.bf16 %v1355_v45, %v1351_v19  ;;  %v1358_v51 = vmul.f32 %v1294_v23, %v1294_v23 }
 0x424   : > { %v1728_v52 = vpack.c.bf16 %v1357_v47, %v1353_v17  ;;  %v1694_v53 = vpack.c.bf16 %v1356_v27, %v1352_v46  ;;  %v1113_v54 = vpop.f32.mrb[60].mxu0 }
 0x425   : > { %v1726_v56 = vpack.c.bf16 %v1358_v51, %v1354_v49  ;;  %v1295_v57 = vsub.f32 %v1113_v54, %v2319_v48  ;;  %v1226_v37 = vpop.f32.mrb[60].mxu1  ;;  %v1115_v28 = vpop.f32.mrb[61].mxu0 }
 0x426   : > { %v1297_v58 = vsub.f32 %v1226_v37, %v2323_v50  ;;  %v1296_v31 = vsub.f32 %v1115_v28, %v2327_v21  ;;  %v1228_v60 = vpop.f32.mrb[61].mxu1  ;;  %v1117_v61 = vpop.f32.mrb[62].mxu0  ;;  %1695 = vmatprep.subr.bf16.mxu0 %v1694_v53 }
 0x427   : > { %v1298_v62 = vsub.f32 %v1228_v60, %v2331_v55  ;;  %v1299_v63 = vsub.f32 %v1117_v61, %v2335_v35  ;;  %v1230_v39 = vpop.f32.mrb[62].mxu1  ;;  %1727 = vmatprep.subr.bf16.mxu1 %v1726_v56  ;;  %v1119_v30 = vpop.f32.mrb[63].mxu0  ;;  %1697 = vmatpush1.bf16.msra.mxu0 %v1696_v18  ;;  %v1359_v6 = vmul.f32 %v1295_v57, %v1295_v57 }
 0x428   : > { %v1361_v1 = vmul.f32 %v1297_v58, %v1297_v58  ;;  %v1301_v3 = vsub.f32 %v1230_v39, %v2339_v59  ;;  %v1300_v4 = vsub.f32 %v1119_v30, %v2343_v36  ;;  %v1232_v5 = vpop.f32.mrb[63].mxu1  ;;  %1729 = vmatpush1.bf16.msra.mxu1 %v1728_v52  ;;  %v1360_v10 = vmul.f32 %v1296_v31, %v1296_v31 }
 0x429   : > { %v1363_v8 = vmul.f32 %v1299_v63, %v1299_v63  ;;  %v1302_v9 = vsub.f32 %v1232_v5, %v2347_v0  ;;  %v1362_v14 = vmul.f32 %v1298_v62, %v1298_v62 }
 0x42a   : > { %v1365_v12 = vmul.f32 %v1301_v3, %v1301_v3  ;;  %v1364_v13 = vmul.f32 %v1300_v4, %v1300_v4 }
 0x42b   : > { %v1700_v15 = vpack.c.bf16 %v1363_v8, %v1359_v6  ;;  %v1366_v20 = vmul.f32 %v1302_v9, %v1302_v9 }
 0x42c   : > { %v1732_v25 = vpack.c.bf16 %v1365_v12, %v1361_v1  ;;  %v1698_v33 = vpack.c.bf16 %v1364_v13, %v1360_v10  ;;  %v1123_v34 = vpop.f32.mrb[64].mxu0 }
 0x42d   : > { %v1730_v22 = vpack.c.bf16 %v1366_v20, %v1362_v14  ;;  %v1303_v38 = vsub.f32 %v1123_v34, %v2287_v2  ;;  %v1236_v26 = vpop.f32.mrb[64].mxu1  ;;  %v1125_v41 = vpop.f32.mrb[65].mxu0 }
 0x42e   : > { %v1305_v17 = vsub.f32 %v1236_v26, %v2291_v32  ;;  %v1304_v42 = vsub.f32 %v1125_v41, %v2295_v7  ;;  %v1238_v43 = vpop.f32.mrb[65].mxu1  ;;  %v1127_v44 = vpop.f32.mrb[66].mxu0  ;;  %1699 = vmatprep.subr.bf16.mxu0 %v1698_v33 }
 0x42f   : > { %v1306_v19 = vsub.f32 %v1238_v43, %v2299_v11  ;;  %v1307_v45 = vsub.f32 %v1127_v44, %v2303_v16  ;;  %v1240_v23 = vpop.f32.mrb[66].mxu1  ;;  %1731 = vmatprep.subr.bf16.mxu1 %v1730_v22  ;;  %v1129_v46 = vpop.f32.mrb[67].mxu0  ;;  %1701 = vmatpush1.bf16.msra.mxu0 %v1700_v15  ;;  %v1367_v32 = vmul.f32 %v1303_v38, %v1303_v38 }
 0x430   : > { %v1369_v47 = vmul.f32 %v1305_v17, %v1305_v17  ;;  %v1309_v2 = vsub.f32 %v1240_v23, %v2307_v24  ;;  %v1308_v27 = vsub.f32 %v1129_v46, %v2311_v29  ;;  %v1242_v49 = vpop.f32.mrb[67].mxu1  ;;  %1733 = vmatpush1.bf16.msra.mxu1 %v1732_v25  ;;  %v1368_v51 = vmul.f32 %v1304_v42, %v1304_v42 }
 0x431   : > { %v1371_v7 = vmul.f32 %v1307_v45, %v1307_v45  ;;  %v1310_v18 = vsub.f32 %v1242_v49, %v2315_v40  ;;  %v1370_v53 = vmul.f32 %v1306_v19, %v1306_v19 }
 0x432   : > { %v1373_v52 = vmul.f32 %v1309_v2, %v1309_v2  ;;  %v1372_v11 = vmul.f32 %v1308_v27, %v1308_v27 }
 0x433   : > { %v1704_v16 = vpack.c.bf16 %v1371_v7, %v1367_v32  ;;  %v1374_v54 = vmul.f32 %v1310_v18, %v1310_v18 }
 0x434   : > { %v1736_v56 = vpack.c.bf16 %v1373_v52, %v1369_v47  ;;  %v1702_v57 = vpack.c.bf16 %v1372_v11, %v1368_v51  ;;  %v1133_v37 = vpop.f32.mrb[68].mxu0 }
 0x435   : > { %v1734_v28 = vpack.c.bf16 %v1374_v54, %v1370_v53  ;;  %v1311_v24 = vsub.f32 %v1133_v37, %v2319_v48  ;;  %v1246_v58 = vpop.f32.mrb[68].mxu1  ;;  %v1135_v29 = vpop.f32.mrb[69].mxu0 }
 0x436   : > { %v1313_v31 = vsub.f32 %v1246_v58, %v2323_v50  ;;  %v1312_v60 = vsub.f32 %v1135_v29, %v2327_v21  ;;  %v1248_v61 = vpop.f32.mrb[69].mxu1  ;;  %v1137_v40 = vpop.f32.mrb[70].mxu0  ;;  %1703 = vmatprep.subr.bf16.mxu0 %v1702_v57 }
 0x437   : > { %v1314_v62 = vsub.f32 %v1248_v61, %v2331_v55  ;;  %v1315_v63 = vsub.f32 %v1137_v40, %v2335_v35  ;;  %v1250_v39 = vpop.f32.mrb[70].mxu1  ;;  %1735 = vmatprep.subr.bf16.mxu1 %v1734_v28  ;;  %v1139_v30 = vpop.f32.mrb[71].mxu0  ;;  %1705 = vmatpush1.bf16.msra.mxu0 %v1704_v16  ;;  %v1375_v50 = vmul.f32 %v1311_v24, %v1311_v24 }
 0x438   : > { %v1377_v1 = vmul.f32 %v1313_v31, %v1313_v31  ;;  %v1317_v48 = vsub.f32 %v1250_v39, %v2339_v59  ;;  %v1316_v3 = vsub.f32 %v1139_v30, %v2343_v36  ;;  %v1252_v4 = vpop.f32.mrb[71].mxu1  ;;  %1737 = vmatpush1.bf16.msra.mxu1 %v1736_v56  ;;  %v1376_v6 = vmul.f32 %v1312_v60, %v1312_v60  ;;  %v1383_v59 = vld [vmem:[%s2401_s1] sm:$0xf] }
 0x439   : > { %v1379_v21 = vmul.f32 %v1315_v63, %v1315_v63  ;;  %v1318_v5 = vsub.f32 %v1252_v4, %v2347_v0  ;;  %v1378_v35 = vmul.f32 %v1314_v62, %v1314_v62 }
 0x43a   : > { %v1381_v55 = vmul.f32 %v1317_v48, %v1317_v48  ;;  %v1380_v8 = vmul.f32 %v1316_v3, %v1316_v3 }
 0x43b   : > { %v1708_v9 = vpack.c.bf16 %v1379_v21, %v1375_v50  ;;  %v1382_v10 = vmul.f32 %v1318_v5, %v1318_v5 }
 0x43c   : > { %v1740_v12 = vpack.c.bf16 %v1381_v55, %v1377_v1  ;;  %v1706_v13 = vpack.c.bf16 %v1380_v8, %v1376_v6 }
 0x43d   : > { %v1738_v14 = vpack.c.bf16 %v1382_v10, %v1378_v35 }
 0x43e   : > { %1707 = vmatprep.subr.bf16.mxu0 %v1706_v13 }
 0x43f   : > { %1739 = vmatprep.subr.bf16.mxu1 %v1738_v14  ;;  %1709 = vmatpush1.bf16.msra.mxu0 %v1708_v9 }
 0x440   : > { %1741 = vmatpush1.bf16.msra.mxu1 %v1740_v12 }
 0x442   : > { %1449 = vmatmul.mubr.f32.vlgmr.msra.gmra.mrb[72].mxu0 %v1383_v59 }
 0x443   : > { %1520 = vmatmul.mubr.f32.vlgmr.msra.gmra.mrb[72].mxu1 %v1383_v59 }
 0x515   : > { %v1450_v36 = vpop.f32.mrb[72].mxu0 }
 0x516   : > { %v1671_v0 = vclamps-f32 %v1450_v36, 100.0  ;;  %v1452_v15 = vpop.f32.mrb[73].mxu0  ;;  %v1521_v20 = vpop.f32.mrb[72].mxu1 }
 0x517   : > { %v1672_v25 = vclamps-f32 %v1452_v15, 100.0  ;;  %v1673_v33 = vclamps-f32 %v1521_v20, 100.0  ;;  %v1523_v34 = vpop.f32.mrb[73].mxu1 }
 0x518   : > { %v1674_v22 = vclamps-f32 %v1523_v34, 100.0 }
 0x519   : > { %v1538_v38 = vcombine.low %v1671_v0, %v1672_v25 }
 0x51a   : > { %v1539_v26 = vcombine.low %v1673_v33, %v1674_v22 }
 0x51b   : > { %1542 = vst [vmem:[%s302_s20] sm:$0xff] %v1538_v38 }
 0x51c   : > { %1543 = vst [vmem:[%s302_s20 + $0x8] sm:$0xff] %v1539_v26 }
 0x51d PF: > { %p13_p9 = scmp.ge.s32.totalorder %s2040_s25, 4   ;;  %s2407_s21 = smov %s1980_s22 }
 0x51e   : > { %s2408_s22 = smov %s2049_s28  ;;  %s2409_s23 = smov %s2040_s25 }
 0x51f   :  { %15 = sbr.rel (!%p13_p9) target bundleno = 2 (0x2), region = 102 }

</bundles_post_ra>
